<compile_context>
chip_gen: v7x
topology: tpu7x:2x2x1
jax: 0.10.0
libtpu: 0.0.40
codegen_flags: <defaults>
</compile_context>

<pallas_src>
import functools

import jax
import jax.numpy as jnp
from jax.experimental import pallas as pl
from jax.experimental.pallas import tpu as pltpu

T_KERNEL = 3  # temporal kernel size (t_kernel=3 default in the module)


def mlp_temporal_kernel(x_ref, tpos_ref, w1_ref, sh1_ref, w2_ref, sh2_ref,
                        o_ref, *, t_len):
    """One (C, Lb) lane-dense slab; Lb is a multiple of t_len.

    x_ref   : (C_in,  Lb)     activations, lane axis = flattened (joint, time)
    tpos_ref: (1, Lb) int32   time index (t mod T) of every lane position
    w1_ref  : (3, C_in, C_in) BN-folded temporal-conv taps (prev, mid, next)
    sh1_ref : (C_in, 1)       BN-folded bias/shift for layer 1
    w2_ref  : (C_out, C_in)   BN-folded 1x1-conv weight
    sh2_ref : (C_out, 1)      BN-folded bias/shift for layer 2
    o_ref   : (C_out, Lb)
    """
    _, lb = x_ref.shape
    x = x_ref[...]
    t_pos = tpos_ref[...]

    # Temporal neighbours via XLU lane rolls; zero the wrapped positions so the
    # behaviour matches Conv2d padding=(0, 1) zero padding along T.
    x_prev = pltpu.roll(x, shift=1, axis=1)         # value at time t-1
    x_next = pltpu.roll(x, shift=lb - 1, axis=1)    # value at time t+1
    x_prev = jnp.where(t_pos == 0, 0.0, x_prev)
    x_next = jnp.where(t_pos == t_len - 1, 0.0, x_next)

    # ---- cnn1 (+BN1 folded) + ReLU: 3 tap matmuls (C_in,C_in)@(C_in,Lb) -----
    h = jnp.dot(w1_ref[0], x_prev, preferred_element_type=jnp.float32)
    h = h + jnp.dot(w1_ref[1], x, preferred_element_type=jnp.float32)
    h = h + jnp.dot(w1_ref[2], x_next, preferred_element_type=jnp.float32)
    h = jnp.maximum(h + sh1_ref[...], 0.0)
    # TODO(synk): Dropout2d(0.2) is identity in eval mode; training-mode
    #             channel dropout is not implemented here.

    # ---- cnn2 (+BN2 folded) + ReLU: (C_out,C_in)@(C_in,Lb) ------------------
    z = jnp.dot(w2_ref[...], h, preferred_element_type=jnp.float32)
    o_ref[...] = jnp.maximum(z + sh2_ref[...], 0.0).astype(o_ref.dtype)


def _pick_lane_block(v, t, target=32768):
    """Largest lane chunk Lb = m*T (m | V) with Lb % 128 == 0 (or Lb == V*T),
    preferring Lb <= target so the grid has multiple pipelined steps and blocks
    stay well inside VMEM (including v7x's 64 MiB)."""
    full = v * t
    cands = [m * t for m in range(1, v + 1) if v % m == 0]
    valid = [lb for lb in cands if lb % 128 == 0 or lb == full]
    small = [lb for lb in valid if lb <= target]
    return max(small) if small else min(valid)


def mlp_temporal(x_nchw, params):
    """x_nchw: (N, C_in, V, T) float32 -> (N, C_out, V, T) float32."""
    n, c_in, v, t = x_nchw.shape
    c_out = params['w2_k'].shape[0]
    l_total = v * t
    lb = _pick_lane_block(v, t)
    grid = (n, l_total // lb)

    # Free (contiguous) reshape: NCHW -> (N, C, V*T). No transpose, no pad.
    x3 = x_nchw.reshape(n, c_in, l_total)
    # Per-lane time index (same for every block since lb % t == 0).
    t_pos = (jnp.arange(lb, dtype=jnp.int32) % t).reshape(1, lb)

    flops = 2 * n * l_total * (T_KERNEL * c_in * c_in + c_in * c_out)
    bytes_accessed = 4 * (n * c_in * l_total + n * c_out * l_total + lb
                          + T_KERNEL * c_in * c_in + c_in
                          + c_out * c_in + c_out)

    out = pl.pallas_call(
        functools.partial(mlp_temporal_kernel, t_len=t),
        out_shape=jax.ShapeDtypeStruct((n, c_out, l_total), x_nchw.dtype),
        grid_spec=pltpu.PrefetchScalarGridSpec(
            num_scalar_prefetch=0,
            grid=grid,
            in_specs=[
                pl.BlockSpec((None, c_in, lb), lambda i, j: (i, 0, j)),
                pl.BlockSpec((1, lb), lambda i, j: (0, 0)),
                pl.BlockSpec((T_KERNEL, c_in, c_in), lambda i, j: (0, 0, 0)),
                pl.BlockSpec((c_in, 1), lambda i, j: (0, 0)),
                pl.BlockSpec((c_out, c_in), lambda i, j: (0, 0)),
                pl.BlockSpec((c_out, 1), lambda i, j: (0, 0)),
            ],
            out_specs=pl.BlockSpec((None, c_out, lb), lambda i, j: (i, 0, j)),
        ),
        compiler_params=pltpu.CompilerParams(
            dimension_semantics=("parallel", "parallel"),
            vmem_limit_bytes=32 * 1024 * 1024),
        cost_estimate=pl.CostEstimate(flops=flops, transcendentals=0,
                                      bytes_accessed=bytes_accessed),
    )(x3, t_pos, params['w1_k'], params['sh1_k'], params['w2_k'],
      params['sh2_k'])

    return out.reshape(n, c_out, v, t)


def init_params(key, c_in, c_out, eps=1e-5):
    ks = jax.random.split(key, 12)
    f32 = jnp.float32
    # cnn1: Conv2d(c_in, c_in, (1, 3), padding=(0, 1)) + BatchNorm2d(c_in)
    w1_t = 0.3 * jax.random.normal(ks[0], (c_in, c_in, 1, T_KERNEL), f32)
    b1 = 0.1 * jax.random.normal(ks[1], (c_in,), f32)
    g1 = 1.0 + 0.1 * jax.random.normal(ks[2], (c_in,), f32)
    beta1 = 0.1 * jax.random.normal(ks[3], (c_in,), f32)
    m1 = 0.05 * jax.random.normal(ks[4], (c_in,), f32)
    v1 = 1.0 + 0.1 * jax.random.uniform(ks[5], (c_in,), f32)
    # cnn2: Conv2d(c_in, c_out, (1, 1)) + BatchNorm2d(c_out)
    w2_t = 0.3 * jax.random.normal(ks[6], (c_out, c_in, 1, 1), f32)
    b2 = 0.1 * jax.random.normal(ks[7], (c_out,), f32)
    g2 = 1.0 + 0.1 * jax.random.normal(ks[8], (c_out,), f32)
    beta2 = 0.1 * jax.random.normal(ks[9], (c_out,), f32)
    m2 = 0.05 * jax.random.normal(ks[10], (c_out,), f32)
    v2 = 1.0 + 0.1 * jax.random.uniform(ks[11], (c_out,), f32)

    s1 = g1 / jnp.sqrt(v1 + eps)
    s2 = g2 / jnp.sqrt(v2 + eps)
    sh1 = beta1 - m1 * s1
    sh2 = beta2 - m2 * s2

    # Kernel-layout, BN-folded params (exact: BN(conv(x)+b) = (s*W)*x + (s*b+sh)):
    #   w1_k[dt, co, ci] = s1[co] * W1[co, ci, 0, dt]
    w1_k = jnp.transpose(w1_t[:, :, 0, :], (2, 0, 1)) * s1[None, :, None]
    sh1_k = (s1 * b1 + sh1).reshape(c_in, 1)
    w2_k = w2_t[:, :, 0, 0] * s2[:, None]
    sh2_k = (s2 * b2 + sh2).reshape(c_out, 1)

    return {
        # torch-layout params (used by the pure-JAX reference)
        'w1_t': w1_t, 'b1': b1, 's1': s1, 'sh1': sh1,
        'w2_t': w2_t, 'b2': b2, 's2': s2, 'sh2': sh2,
        # kernel-layout, BN-folded params
        'w1_k': w1_k, 'sh1_k': sh1_k, 'w2_k': w2_k, 'sh2_k': sh2_k,
    }


def reference_forward(x_nchw, p):
    """Pure-JAX reference matching the PyTorch forward (eval mode)."""
    dn = ('NCHW', 'OIHW', 'NCHW')
    pad = T_KERNEL // 2
    y = jax.lax.conv_general_dilated(x_nchw, p['w1_t'], (1, 1),
                                     ((0, 0), (pad, pad)),
                                     dimension_numbers=dn)
    y = y + p['b1'][None, :, None, None]
    y = y * p['s1'][None, :, None, None] + p['sh1'][None, :, None, None]
    y = jnp.maximum(y, 0.0)
    z = jax.lax.conv_general_dilated(y, p['w2_t'], (1, 1),
                                     ((0, 0), (0, 0)),
                                     dimension_numbers=dn)
    z = z + p['b2'][None, :, None, None]
    z = z * p['s2'][None, :, None, None] + p['sh2'][None, :, None, None]
    return jnp.maximum(z, 0.0)


if __name__ == "__main__":
    key = jax.random.PRNGKey(0)
    k_x, k_p = jax.random.split(key)

    N, C_IN, V, T = 2, 4, 16, 16     # (batch, channels, joints, time)
    C_OUT = 8

    x = jax.random.normal(k_x, (N, C_IN, V, T), jnp.float32)
    params = init_params(k_p, C_IN, C_OUT)

    out = jax.block_until_ready(mlp_temporal(x, params))
    ref = jax.block_until_ready(reference_forward(x, params))

    assert out.shape == (N, C_OUT, V, T), out.shape
    assert jnp.allclose(out, ref, atol=1e-4, rtol=1e-4), \
        float(jnp.max(jnp.abs(out - ref)))

    print("KERNEL_OK")
</pallas_src>

<mosaic_0001>
module attributes {stable_mosaic.version = 11 : i64} {
  func.func @mlp_temporal_kernel(%arg0: i32, %arg1: i32, %arg2: memref<1x4x256xf32, #tpu.memory_space<vmem>>, %arg3: memref<1x256xi32, #tpu.memory_space<vmem>>, %arg4: memref<3x4x4xf32, #tpu.memory_space<vmem>>, %arg5: memref<4x1xf32, #tpu.memory_space<vmem>>, %arg6: memref<8x4xf32, #tpu.memory_space<vmem>>, %arg7: memref<8x1xf32, #tpu.memory_space<vmem>>, %arg8: memref<1x8x256xf32, #tpu.memory_space<vmem>>) attributes {dimension_semantics = [#tpu.dimension_semantics<parallel>, #tpu.dimension_semantics<parallel>], iteration_bounds = array<i64: 2, 1>, scalar_prefetch = 0 : i64, scratch_operands = 0 : i64, tpu.core_type = #tpu.core_type<tc>, window_params = [{transform_indices = @transform_0, window_bounds = array<i64: 1, 4, 256>}, {pipeline_mode = #tpu.pipeline_mode<synchronous>, transform_indices = @transform_1, window_bounds = array<i64: 1, 256>}, {pipeline_mode = #tpu.pipeline_mode<synchronous>, transform_indices = @transform_2, window_bounds = array<i64: 3, 4, 4>}, {pipeline_mode = #tpu.pipeline_mode<synchronous>, transform_indices = @transform_3, window_bounds = array<i64: 4, 1>}, {pipeline_mode = #tpu.pipeline_mode<synchronous>, transform_indices = @transform_4, window_bounds = array<i64: 8, 4>}, {pipeline_mode = #tpu.pipeline_mode<synchronous>, transform_indices = @transform_5, window_bounds = array<i64: 8, 1>}, {transform_indices = @transform_6, window_bounds = array<i64: 1, 8, 256>}]} {
    %c0 = arith.constant 0 : index
    %c0_0 = arith.constant 0 : index
    %c0_1 = arith.constant 0 : index
    %0 = vector.load %arg2[%c0, %c0_0, %c0_1] : memref<1x4x256xf32, #tpu.memory_space<vmem>>, vector<1x4x256xf32>
    %1 = vector.shape_cast %0 : vector<1x4x256xf32> to vector<4x256xf32>
    %c0_2 = arith.constant 0 : index
    %c0_3 = arith.constant 0 : index
    %2 = vector.load %arg3[%c0_2, %c0_3] : memref<1x256xi32, #tpu.memory_space<vmem>>, vector<1x256xi32>
    %c1_i32 = arith.constant 1 : i32
    %3 = tpu.dynamic_rotate %1 by %c1_i32 dim 1 : vector<4x256xf32>, i32 -> vector<4x256xf32>
    %c255_i32 = arith.constant 255 : i32
    %4 = tpu.dynamic_rotate %1 by %c255_i32 dim 1 : vector<4x256xf32>, i32 -> vector<4x256xf32>
    %c0_i32 = arith.constant 0 : i32
    %5 = vector.broadcast %c0_i32 : i32 to vector<1x256xi32>
    %6 = arith.cmpi eq, %2, %5 : vector<1x256xi32>
    %cst = arith.constant 0.000000e+00 : f32
    %7 = vector.shape_cast %6 : vector<1x256xi1> to vector<1x256xi1>
    %8 = vector.broadcast %7 : vector<1x256xi1> to vector<4x256xi1>
    %9 = vector.broadcast %cst : f32 to vector<4x256xf32>
    %10 = arith.select %8, %9, %3 : vector<4x256xi1>, vector<4x256xf32>
    %c15_i32 = arith.constant 15 : i32
    %11 = vector.broadcast %c15_i32 : i32 to vector<1x256xi32>
    %12 = arith.cmpi eq, %2, %11 : vector<1x256xi32>
    %cst_4 = arith.constant 0.000000e+00 : f32
    %13 = vector.shape_cast %12 : vector<1x256xi1> to vector<1x256xi1>
    %14 = vector.broadcast %13 : vector<1x256xi1> to vector<4x256xi1>
    %15 = vector.broadcast %cst_4 : f32 to vector<4x256xf32>
    %16 = arith.select %14, %15, %4 : vector<4x256xi1>, vector<4x256xf32>
    %c0_5 = arith.constant 0 : index
    %c0_6 = arith.constant 0 : index
    %c0_7 = arith.constant 0 : index
    %17 = vector.load %arg4[%c0_5, %c0_6, %c0_7] : memref<3x4x4xf32, #tpu.memory_space<vmem>>, vector<1x4x4xf32>
    %18 = vector.shape_cast %17 : vector<1x4x4xf32> to vector<4x4xf32>
    %cst_8 = arith.constant dense<0.000000e+00> : vector<4x256xf32>
    %19 = tpu.matmul %18, %10, %cst_8 {dimension_numbers = #tpu.dot_dimension_numbers<[1], [0], [0], [1], [0, 0, 1, 1], [], []>} : vector<4x4xf32>, vector<4x256xf32>, vector<4x256xf32> -> vector<4x256xf32>
    %c1 = arith.constant 1 : index
    %c0_9 = arith.constant 0 : index
    %c0_10 = arith.constant 0 : index
    %20 = vector.load %arg4[%c1, %c0_9, %c0_10] : memref<3x4x4xf32, #tpu.memory_space<vmem>>, vector<1x4x4xf32>
    %21 = vector.shape_cast %20 : vector<1x4x4xf32> to vector<4x4xf32>
    %cst_11 = arith.constant dense<0.000000e+00> : vector<4x256xf32>
    %22 = tpu.matmul %21, %1, %cst_11 {dimension_numbers = #tpu.dot_dimension_numbers<[1], [0], [0], [1], [0, 0, 1, 1], [], []>} : vector<4x4xf32>, vector<4x256xf32>, vector<4x256xf32> -> vector<4x256xf32>
    %23 = arith.addf %19, %22 : vector<4x256xf32>
    %c2 = arith.constant 2 : index
    %c0_12 = arith.constant 0 : index
    %c0_13 = arith.constant 0 : index
    %24 = vector.load %arg4[%c2, %c0_12, %c0_13] : memref<3x4x4xf32, #tpu.memory_space<vmem>>, vector<1x4x4xf32>
    %25 = vector.shape_cast %24 : vector<1x4x4xf32> to vector<4x4xf32>
    %cst_14 = arith.constant dense<0.000000e+00> : vector<4x256xf32>
    %26 = tpu.matmul %25, %16, %cst_14 {dimension_numbers = #tpu.dot_dimension_numbers<[1], [0], [0], [1], [0, 0, 1, 1], [], []>} : vector<4x4xf32>, vector<4x256xf32>, vector<4x256xf32> -> vector<4x256xf32>
    %27 = arith.addf %23, %26 : vector<4x256xf32>
    %c0_15 = arith.constant 0 : index
    %c0_16 = arith.constant 0 : index
    %28 = vector.load %arg5[%c0_15, %c0_16] : memref<4x1xf32, #tpu.memory_space<vmem>>, vector<4x1xf32>
    %29 = vector.broadcast %28 : vector<4x1xf32> to vector<4x256xf32>
    %30 = arith.addf %27, %29 : vector<4x256xf32>
    %cst_17 = arith.constant 0.000000e+00 : f32
    %31 = vector.broadcast %cst_17 : f32 to vector<4x256xf32>
    %32 = arith.maximumf %30, %31 : vector<4x256xf32>
    %c0_18 = arith.constant 0 : index
    %c0_19 = arith.constant 0 : index
    %33 = vector.load %arg6[%c0_18, %c0_19] : memref<8x4xf32, #tpu.memory_space<vmem>>, vector<8x4xf32>
    %cst_20 = arith.constant dense<0.000000e+00> : vector<8x256xf32>
    %34 = tpu.matmul %33, %32, %cst_20 {dimension_numbers = #tpu.dot_dimension_numbers<[1], [0], [0], [1], [0, 0, 1, 1], [], []>} : vector<8x4xf32>, vector<4x256xf32>, vector<8x256xf32> -> vector<8x256xf32>
    %c0_21 = arith.constant 0 : index
    %c0_22 = arith.constant 0 : index
    %35 = vector.load %arg7[%c0_21, %c0_22] : memref<8x1xf32, #tpu.memory_space<vmem>>, vector<8x1xf32>
    %36 = vector.broadcast %35 : vector<8x1xf32> to vector<8x256xf32>
    %37 = arith.addf %34, %36 : vector<8x256xf32>
    %cst_23 = arith.constant 0.000000e+00 : f32
    %38 = vector.broadcast %cst_23 : f32 to vector<8x256xf32>
    %39 = arith.maximumf %37, %38 : vector<8x256xf32>
    %c0_24 = arith.constant 0 : index
    %c0_25 = arith.constant 0 : index
    %c0_26 = arith.constant 0 : index
    %40 = vector.load %arg8[%c0_24, %c0_25, %c0_26] : memref<1x8x256xf32, #tpu.memory_space<vmem>>, vector<1x8x256xf32>
    %41 = vector.shape_cast %40 : vector<1x8x256xf32> to vector<8x256xf32>
    %42 = vector.shape_cast %39 : vector<8x256xf32> to vector<1x8x256xf32>
    tpu.vector_store %arg8[%c0_24, %c0_25, %c0_26], %42 {strides = array<i32>} : memref<1x8x256xf32, #tpu.memory_space<vmem>>, vector<1x8x256xf32>,
    return
  }
  func.func @transform_0(%arg0: i32, %arg1: i32) -> (i32, i32, i32) {
    %c0_i32 = arith.constant 0 : i32
    %c0_i32_0 = arith.constant 0 : i32
    return %arg0, %c0_i32, %arg1 : i32, i32, i32
  }
  func.func @transform_1(%arg0: i32, %arg1: i32) -> (i32, i32) {
    %c0_i32 = arith.constant 0 : i32
    %c0_i32_0 = arith.constant 0 : i32
    %c0_i32_1 = arith.constant 0 : i32
    return %c0_i32, %c0_i32_0 : i32, i32
  }
  func.func @transform_2(%arg0: i32, %arg1: i32) -> (i32, i32, i32) {
    %c0_i32 = arith.constant 0 : i32
    %c0_i32_0 = arith.constant 0 : i32
    %c0_i32_1 = arith.constant 0 : i32
    %c0_i32_2 = arith.constant 0 : i32
    return %c0_i32, %c0_i32_0, %c0_i32_1 : i32, i32, i32
  }
  func.func @transform_3(%arg0: i32, %arg1: i32) -> (i32, i32) {
    %c0_i32 = arith.constant 0 : i32
    %c0_i32_0 = arith.constant 0 : i32
    %c0_i32_1 = arith.constant 0 : i32
    return %c0_i32, %c0_i32_0 : i32, i32
  }
  func.func @transform_4(%arg0: i32, %arg1: i32) -> (i32, i32) {
    %c0_i32 = arith.constant 0 : i32
    %c0_i32_0 = arith.constant 0 : i32
    %c0_i32_1 = arith.constant 0 : i32
    return %c0_i32, %c0_i32_0 : i32, i32
  }
  func.func @transform_5(%arg0: i32, %arg1: i32) -> (i32, i32) {
    %c0_i32 = arith.constant 0 : i32
    %c0_i32_0 = arith.constant 0 : i32
    %c0_i32_1 = arith.constant 0 : i32
    return %c0_i32, %c0_i32_0 : i32, i32
  }
  func.func @transform_6(%arg0: i32, %arg1: i32) -> (i32, i32, i32) {
    %c0_i32 = arith.constant 0 : i32
    %c0_i32_0 = arith.constant 0 : i32
    return %arg0, %c0_i32, %arg1 : i32, i32, i32
  }
}

</mosaic_0001>

<bundles_post_ra>
// kernel: tpu_custom_call.1
= control target key start
LH: loop header
LB: loop body
LE: loop exit
PB: predicated region body
PF: predicated region fallthrough
CT: control target
= control target key end

     0   :  { %11 = vsyncpa [#allocation3], 0  ;;  %s1237_s0 = inlined_call_operand.vmem [shape: f32[2,4,256], index: 0, kind: input, shape index: {}]   ;;  %s1238_s1 = inlined_call_operand.hbm [shape: s32[1,256], index: 1, kind: input, shape index: {}]   ;;  %s1239_s2 = inlined_call_operand.vmem [shape: f32[3,4,4], index: 2, kind: input, shape index: {}]   ;;  %s1240_s3 = inlined_call_operand.vmem [shape: f32[4,1], index: 3, kind: input, shape index: {}]   ;;  %s1241_s4 = inlined_call_operand.vmem [shape: f32[8,4], index: 4, kind: input, shape index: {}]   ;;  %s1242_s5 = inlined_call_operand.vmem [shape: f32[8,1], index: 5, kind: input, shape index: {}]   ;;  %s1243_s6 = inlined_call_operand.hbm [shape: f32[2,8,256], index: 6, kind: output, shape index: {}]  }
   0x1   :  { %12 = vsyncpa [#allocation4], 0 }
   0x2   :  { %14 = vsyncpa [#allocation4 + $0x1], 0  ;;  %s1057_s21 = smov 0   ;;  %s1059_s22 = smov 0  }
   0x3   :  { %s1061_s23 = smov 0   ;;  %s1063_s24 = smov 0  }
   0x4   :  { %s1065_s25 = smov 0   ;;  %s1067_s26 = smov 0  }
   0x5 LB: > { %s796_s27 = sadd.s32 4294967295, %s1014_s26   ;;  %s797_s28 = sadd.s32 4294967294, %s1014_s26   ;;  %s1014_s26 = sphi %s1067_s26, %s20_s26   ;;  %s1010_s25 = sphi %s1065_s25, %s1261_s25   ;;  %s1006_s24 = sphi %s1063_s24, %s1260_s24   ;;  %s1002_s23 = sphi %s1061_s23, %s1259_s23   ;;  %s998_s22 = sphi %s1059_s22, %s1258_s22   ;;  %s994_s21 = sphi %s1057_s21, %s1257_s21  }
   0x6   : > { %s32_s29 = sadd.s32 1, %s1010_s25  ;;  %s174_s30 = sadd.s32 1, %s1002_s23 }
   0x7   : > { %p34_p0 = scmp.ge.s32.totalorder %s32_s29, 2  ;;  %p184_p1 = scmp.ne.s32.totalorder %s1002_s23, %s998_s22 }
   0x8   : > { %p185_p2 = scmp.eq.s32.totalorder %s796_s27, 1  ;;  %p190_p3 = scmp.ne.s32.totalorder %s998_s22, %s994_s21 }
   0x9   : > { %s1263_s29 = smov (%p34_p0, %s32_s29), 0  ;;  %p191_p5 = scmp.eq.s32.totalorder %s797_s28, 1 }
   0xa   : > { %p1097_p4 = por %p185_p2, %p184_p1  ;;  %s169_s8 = ssub.s32 %s1010_s25, %s1263_s29 }
   0xb   : > { %p798_p6 = scmp.ge.s32.totalorder %s1014_s26, 1  ;;  %p172_p7 = scmp.eq.s32.totalorder %s169_s8, 0 }
   0xc   : > { %s1248_s7 = scalar_select %p1097_p4, 1, 0 }
   0xd   : > { %p1104_p8 = por %p191_p5, %p190_p3  ;;  %p198_p9 = scmp.lt.s32.totalorder %s1014_s26, 3 }
   0xe   : > { %s1110_s10 = scalar_select %p172_p7, %s1002_s23, %s174_s30  }
   0xf   : > { %s1249_s9 = scalar_select %p1104_p8, 1, 0 }
  0x10   : > { %p1112_p10 = pnand %p798_p6, %p198_p9  ;;  %p1116_p11 = scmp.eq.s32.totalorder %s796_s27, 0 }
  0x11   : > { %s1016_s13 = smov [#allocation2]   ;;  %s904_s18 = scalar_lea.hbm %s1238_s1, 32 }
  0x12   : > { %s1250_s11 = scalar_select %p1112_p10, 1, 0 }
  0x13   : > { %s1251_s12 = scalar_select %p1116_p11, 1, 0 }
  0x14   : > { %p837_p12 = pneg %p1112_p10  ;;  %s211_s14 = sshll.u32 %s1016_s13, 4  ;;  %s212_s14 = int_to_ptr.vmem [resolvable:$true] %s211_s14 }
  0x15   : > { %p905_p0 = scmp.ne.s32.totalorder %s1238_s1, %s904_s18  ;;  %p911_p5 = scmp.lt.u32.totalorder %s904_s18, %s1238_s1 }
  0x16   : > { %p1124_p13 = pnand %p1116_p11, %p837_p12 }
  0x18   : > { %p906_p1 = pneg %p1124_p13 }
  0x1a   : > { %p907_p2 = pnand %p906_p1, %p905_p0 }
  0x1c   : > { %p908_p3 = pneg %p907_p2 }
  0x1e   : > { %p913_p6 = pnand %p911_p5, %p908_p3 }
  0x20   : > { %916 = shalt.err (!%p913_p6)
}
  0x21   : > { %s917_s30 = scalar_lea.vmem %s212_s14, 32  ;;  %p925_p8 = scmp.lt.s32.totalorder %s212_s14, %s212_s14 }
  0x22   : > { %p918_p7 = scmp.ne.s32.totalorder %s212_s14, %s917_s30  ;;  %p926_p4 = scmp.lt.s32.totalorder %s917_s30, %s917_s30 }
  0x24   : > { %p920_p9 = pnand %p918_p7, %p906_p1  ;;  %p927_p11 = por %p926_p4, %p925_p8 }
  0x26   : > { %p921_p12 = pneg %p920_p9 }
  0x28   : > { %p928_p10 = pnand %p927_p11, %p921_p12 }
  0x2a   : > { %931 = shalt.err (!%p928_p10)
}
  0x2b   : > { %840 = dma.hbm_to_vmem [thread:$0]  (!%p1124_p13), %s1238_s1, 32, %s212_s14, [#allocation3]  }
  0x2c   : > { %p1253_p0 = scmp.ne.s32.totalorder %s1250_s11, 0 }
  0x2d   : > { %p1254_p2 = scmp.ne.s32.totalorder (!%p1253_p0), %s1251_s12, 0 }
  0x2e   : > { %249 = sbr.rel (%p1253_p0) target bundleno = 644 (0x284), region = 44 }
  0x35   : > { %985 = dma.done.wait (%p1254_p2), [#allocation3], 32  }
  0x36   : > { %987 = vsyncadd (%p1254_p2), [#allocation3], 4294967264  ;;  %p284_p4 = scmp.lt.s32.totalorder %s1006_s24, 1  ;;  %v1017_v0 = vmov 0   ;;  %v1018_v1 = vmov 0.0   ;;  %s1019_s18 = smov 127   ;;  %v303_v6 = vlaneseq }
  0x37   : > { %901 = vset.pattern.permute.xlu0 %v1017_v0  ;;  %902 = vset.pattern.permute.xlu1 %v1017_v0  ;;  %s1020_s12 = smov 1   ;;  %vm350_vm0 = vcmask 1043456   ;;  %v806_v4 = vld [vmem:[%s1239_s2 + $0x4] sm:$0xf]  ;;  %vm346_vm1 = vcmask 31744   ;;  %s826_s19 = sshll.u32 %s1006_s24, 8 }
  0x38   : > { %s285_s15 = scalar_select %p284_p4, %s1006_s24, 1  ;;  %499 = vmatprep.mubr.f32.mxu0 %v1018_v1  ;;  %419 = vmatprep.mubr.f32.mxu1 %v1018_v1  ;;  %v590_v5 = vld [vmem:[%s1240_s3] sm:$0xf]  ;;  %v318_v8 = vshrl.u32 %v303_v6, 7  ;;  %v304_v13 = vand.u32 127, %v303_v6 }
  0x39   : > { %v295_v7 = vld [vmem:[#allocation2] sm:$0x3]  ;;  %v813_v31 = vld [vmem:[%s1239_s2 + $0x8] sm:$0xf]  ;;  %s1190_s8 = scalar_lea.hbm %s1243_s6, %s826_s19  ;;  %p1255_p10 = scmp.ne.s32.totalorder %s1248_s7, 0 }
  0x3a   : > { %s825_s14 = sshll.u32 %s285_s15, 3  ;;  %vm329_vm2 = vcmp.eq.s32.totalorder %v295_v7, 15  ;;  %vm315_vm3 = vcmp.eq.s32.totalorder %v295_v7, 0  ;;  %v319_v9 = vsub.s32 0, %v318_v8  ;;  %v323_v10 = vsub.s32 1, %v318_v8  ;;  %v601_v34 = vld [vmem:[%s1242_s5] sm:$0xff] }
  0x3b   : > { %s291_s17 = scalar_lea.vmem %s1237_s0, %s825_s14  ;;  %v330_v11 = vsel %vm329_vm2, 1, %v1017_v0  ;;  %v316_v12 = vsel %vm315_vm3, 1, %v1017_v0  ;;  %vm312_vm4 = vcmp.lt.s32.totalorder %v304_v13, 127  ;;  %vm305_vm5 = vcmp.lt.s32.totalorder %v304_v13, 1  ;;  %v343_v29 = vld [vmem:[%s1239_s2] sm:$0xf] }
  0x3c   : > { %v294_v2 = vld [vmem:[%s291_s17] sm:$0xff]  ;;  %v338_v14 = vrot.slane %v330_v11, %v323_v10  ;;  %v324_v15 = vrot.slane %v316_v12, %v323_v10  ;;  %v320_v16 = vrot.slane %v316_v12, %v319_v9  ;;  %v334_v19 = vrot.slane %v330_v11, %v319_v9  ;;  %s1021_s24 = smov [#allocation5]  }
  0x3d   : > { %308 = vrot.lane.b32.xlu1 %v294_v2, %s1019_s18  ;;  %299 = vrot.lane.b32.xlu0 %v294_v2, %s1020_s12  ;;  %v297_v3 = vcombine.high %v294_v2, %v294_v2  ;;  %v600_v44 = vld [vmem:[%s1241_s4] sm:$0xff]  ;;  %s936_s14 = sshll.u32 %s1021_s24, 4  ;;  %s937_s14 = int_to_ptr.vmem [resolvable:$false] %s936_s14 }
  0x3e   : > { %vm340_vm6 = vcmp.eq.s32.totalorder %v338_v14, 1  ;;  %vm326_vm7 = vcmp.eq.s32.totalorder %v324_v15, 1  ;;  %vm325_vm8 = vcmp.eq.s32.totalorder %v320_v16, 1  ;;  %vm339_vm9 = vcmp.eq.s32.totalorder %v334_v19, 1  ;;  %s938_s16 = scalar_lea.vmem %s937_s14, 512 }
  0x3f   : > { %807 = vmatprep.subr.msk.mxu1 %vm350_vm0, %v297_v3 }
  0x40   : > { %808 = vmatpush1.msk.msra.mxu1 %vm350_vm0, %v294_v2 }
  0x41   : > { %310 = vrot.lane.b32.xlu1 %v297_v3, %s1019_s18  ;;  %301 = vrot.lane.b32.xlu0 %v297_v3, %s1020_s12  ;;  %s280_s18 = sand.u32 1, %s998_s22  }
  0x42   : > { %809 = vmatmul.mubr.msk.f32.vlgmr.msra.gmra.mrb[0].mxu1 %vm346_vm1, %v806_v4  ;;  %s803_s12 = sshll.u32 %s280_s18, 4  ;;  %s692_s13 = scalar_lea.sflag [#allocation4], %s280_s18 }
  0x43   : > { %680 = vmatprep.mubr.f32.mxu1 %v1018_v1  ;;  %s282_s20 = scalar_lea.vmem [#allocation5], %s803_s12 }
  0x44   : > { %s708_s27 = sshll.u32 %s282_s20, 4  ;;  %s1192_s27 = int_to_ptr.vmem [resolvable:$true] %s708_s27 }
  0x45   : > { %593 = vperm.xlu0 %901, %v590_v5   ;;  %604 = vperm.xlu1 %902, %v601_v34   ;;  %s932_s15 = scalar_lea.vmem %s1192_s27, 256  ;;  %p939_p1 = scmp.lt.s32.totalorder %s1192_s27, %s937_s14 }
  0x46   : > { %p933_p8 = scmp.ne.s32.totalorder %s1192_s27, %s932_s15  ;;  %p940_p3 = scmp.lt.s32.totalorder %s938_s16, %s932_s15 }
  0x48   : > { %p934_p11 = pnand %p933_p8, %p1255_p10  ;;  %p941_p5 = por %p940_p3, %p939_p1 }
  0x4a   : > { %p935_p13 = pneg %p934_p11 }
  0x4c   : > { %p942_p6 = pnand %p941_p5, %p935_p13 }
  0xaf   : > { %v309_v17 = vpop.permute.xlu1 %308  ;;  %v300_v18 = vpop.permute.xlu0 %299 }
  0xb3   : > { %v311_v20 = vpop.permute.xlu1 %310  ;;  %v302_v21 = vpop.permute.xlu0 %301 }
  0xb4   : > { %v313_v22 = vsel %vm312_vm4, %v309_v17, %v311_v20  ;;  %v314_v23 = vsel %vm312_vm4, %v311_v20, %v309_v17  ;;  %v307_v24 = vsel %vm305_vm5, %v302_v21, %v300_v18  ;;  %v306_v25 = vsel %vm305_vm5, %v300_v18, %v302_v21 }
  0xb5   : > { %v342_v26 = vsel %vm340_vm6, 0.0, %v314_v23  ;;  %v328_v27 = vsel %vm326_vm7, 0.0, %v306_v25  ;;  %v327_v28 = vsel %vm325_vm8, 0.0, %v307_v24  ;;  %v341_v30 = vsel %vm339_vm9, 0.0, %v313_v22 }
  0xb6   : > { %810 = vmatprep.subr.msk.mxu0 %vm350_vm0, %v328_v27 }
  0xb7   : > { %811 = vmatpush1.msk.msra.mxu0 %vm350_vm0, %v327_v28 }
  0xb8   : > { %812 = vmatmul.mubr.msk.f32.vlgmr.msra.gmra.mrb[0].mxu0 %vm346_vm1, %v343_v29  ;;  %814 = vmatprep.subr.msk.mxu0 %vm350_vm0, %v342_v26 }
  0xb9   : > { %815 = vmatpush1.msk.msra.mxu0 %vm350_vm0, %v341_v30  ;;  %581 = vmatprep.mubr.f32.mxu0 %v1018_v1 }
  0xc0   : > { %816 = vmatmul.mubr.msk.f32.vlgmr.msra.gmra.mrb[0].mxu0 %vm346_vm1, %v813_v31 }
  0xc4   : > { %v594_v36 = vpop.permute.xlu0 %593  ;;  %v605_v45 = vpop.permute.xlu1 %604 }
 0x115   : > { %v421_v32 = vpop.f32.mrb[0].mxu1 }
 0x116   : > { %v423_v33 = vpop.f32.mrb[1].mxu1 }
 0x193   : > { %v583_v35 = vpop.f32.mrb[0].mxu0 }
 0x194   : > { %v827_v37 = vadd.f32 %v583_v35, %v421_v32  ;;  %v585_v38 = vpop.f32.mrb[1].mxu0 }
 0x195   : > { %v828_v39 = vadd.f32 %v585_v38, %v423_v33 }
 0x196   : > { %v596_v40 = vadd.f32 %v827_v37, %v594_v36 }
 0x197   : > { %v597_v41 = vadd.f32 %v828_v39, %v594_v36 }
 0x198   : > { %v598_v43 = vmax.f32 %v596_v40, 0.0 }
 0x199   : > { %v599_v42 = vmax.f32 %v597_v41, 0.0 }
 0x19b   : > { %817 = vmatprep.subr.msk.mxu1 %vm350_vm0, %v599_v42 }
 0x19c   : > { %818 = vmatpush1.msk.msra.mxu1 %vm350_vm0, %v598_v43 }
 0x19d   : > { %819 = vmatmul.mubr.msk.f32.vlgmr.msra.gmra.mrb[2].mxu1 %vm346_vm1, %v600_v44 }
 0x270   : > { %v682_v46 = vpop.f32.mrb[2].mxu1 }
 0x271   : > { %v683_v47 = vadd.f32 %v682_v46, %v605_v45  ;;  %v684_v48 = vpop.f32.mrb[3].mxu1 }
 0x272   : > { %v685_v49 = vadd.f32 %v684_v48, %v605_v45 }
 0x273   : > { %v687_v50 = vmax.f32 %v683_v47, 0.0 }
 0x274   : > { %v688_v51 = vmax.f32 %v685_v49, 0.0 }
 0x275   : > { %689 = vst [vmem:[%s282_s20] sm:$0xff] %v687_v50 }
 0x276   : > { %690 = vst [vmem:[%s282_s20 + $0x8] sm:$0xff] %v688_v51 }
 0x277   : > { %945 = shalt.err (!%p942_p6)
}
 0x278   : > { %s946_s11 = scalar_lea.hbm %s1190_s8, 256  ;;  %s950_s12 = scalar_lea.hbm %s1243_s6, 512 }
 0x279   : > { %p947_p7 = scmp.ne.s32.totalorder %s1190_s8, %s946_s11  ;;  %p951_p0 = scmp.lt.u32.totalorder %s1190_s8, %s1243_s6 }
 0x27a   : > { %p952_p2 = scmp.lt.u32.totalorder %s950_s12, %s946_s11  ;;  %p954_p8 = scmp.lt.u32.totalorder %s946_s11, %s1190_s8 }
 0x27b   : > { %p948_p9 = pnand %p947_p7, %p1255_p10 }
 0x27c   : > { %p953_p4 = por %p952_p2, %p951_p0 }
 0x27d   : > { %p949_p12 = pneg %p948_p9 }
 0x27e   : > { %p955_p11 = por %p954_p8, %p953_p4 }
 0x280   : > { %p956_p13 = pnand %p955_p11, %p949_p12 }
 0x282   : > { %959 = shalt.err (!%p956_p13)
}
 0x283   : > { %835 = dma.vmem_to_hbm [thread:$0]  (%p1255_p10), %s1192_s27, 256, %s1190_s8, %s692_s13  }
 0x284 PF: > { %p847_p1 = scmp.ge.s32.totalorder %s1014_s26, 2  ;;  %s720_s28 = sand.u32 1, %s994_s21  }
 0x285   : > { %p1256_p3 = scmp.ne.s32.totalorder %s1249_s9, 0  ;;  %s721_s30 = scalar_lea.sflag [#allocation4], %s720_s28 }
 0x287   : > { %p842_p5 = pnand %p847_p1, %p1256_p3 }
 0x289   : > { %989 = dma.done.wait (!%p842_p5), %s721_s30, 256  }
 0x28a   : > { %991 = vsyncadd (!%p842_p5), %s721_s30, 4294967040  ;;  %s20_s26 = sadd.s32 1, %s1014_s26   ;;  %s1257_s21 = smov %s998_s22 }
 0x28b   : > { %p17_p6 = scmp.ge.s32.totalorder %s20_s26, 4   ;;  %s1258_s22 = smov %s1002_s23 }
 0x28c   : > { %s1259_s23 = smov %s1110_s10  ;;  %s1260_s24 = smov %s1010_s25 }
 0x28d   : > { %s1261_s25 = smov %s1263_s29  ;;  %19 = sbr.rel (!%p17_p6) target bundleno = 5 (0x5), region = 86 }
 0x294   :  { %726 = vsyncpa [#allocation3], 1 }
 0x295   :  { %728 = vsyncpa [#allocation3 + $0x1], 1 }
 0x296   :  { %729 = vsyncpa [#allocation4], 1 }
 0x297   :  { %731 = vsyncpa [#allocation4 + $0x1], 1 }

</bundles_post_ra>
